<compile_context>
chip_gen: v7x
topology: tpu7x:2x2x1
jax: 0.10.0
libtpu: 0.0.40
codegen_flags: <defaults>
</compile_context>

<pallas_src>
import functools

import jax
import jax.numpy as jnp
from jax import lax
from jax.experimental import pallas as pl
from jax.experimental.pallas import tpu as pltpu

GLOBAL_CONST = 0.5
ENC_STRIDE = 4


def _round_up(x, m):
    return ((x + m - 1) // m) * m


def _pick_tile(n, max_tile, unit):
    """Largest tile (multiple of `unit`, <= max_tile) covering n; prefer >=2 grid
    steps when possible so v7x's two TensorCores both get work."""
    t = min(max_tile, _round_up(n, unit))
    if _round_up(n, t) // t < 2 and n > unit:
        t = max(unit, _round_up(-(-n // 2), unit))
    return t


# ----------------------------------------------------------------------------
# Pallas kernels
# ----------------------------------------------------------------------------
def linproj_kernel(x_ref, w_ref, b_ref, o_ref):
    # x_ref: [TR, K] bf16 patch pixels, w_ref: [K, C] bf16, b_ref: [1, C] f32
    acc = jnp.dot(x_ref[...], w_ref[...], preferred_element_type=jnp.float32)
    o_ref[...] = (acc + b_ref[...]).astype(o_ref.dtype)


def pallas_linproj(x_bf16, w_bf16, b_f32):
    P, K = x_bf16.shape
    C = w_bf16.shape[1]
    TR = _pick_tile(P, 4096, 8)
    P_pad = _round_up(P, TR)
    if P_pad != P:
        x_bf16 = jnp.pad(x_bf16, ((0, P_pad - P), (0, 0)))
    out = pl.pallas_call(
        linproj_kernel,
        out_shape=jax.ShapeDtypeStruct((P_pad, C), jnp.bfloat16),
        grid=(P_pad // TR,),
        in_specs=[
            pl.BlockSpec((TR, K), lambda i: (i, 0)),
            pl.BlockSpec((K, C), lambda i: (0, 0)),
            pl.BlockSpec((1, C), lambda i: (0, 0)),
        ],
        out_specs=pl.BlockSpec((TR, C), lambda i: (i, 0)),
        compiler_params=pltpu.CompilerParams(
            dimension_semantics=("parallel",)),
    )(x_bf16, w_bf16, b_f32)
    return out[:P] if P_pad != P else out


def masked_sum_kernel(m_ref, f_ref, o_ref):
    # m_ref: [NB, 2, THW] bf16 (fg/bg downsampled masks)
    # f_ref: [NB, THW, C] bf16 features, o_ref: [NB, 2, C] f32 resident accumulator
    @pl.when(pl.program_id(1) == 0)
    def _():
        o_ref[...] = jnp.zeros_like(o_ref)

    o_ref[...] += jnp.einsum('nkh,nhc->nkc', m_ref[...], f_ref[...],
                             preferred_element_type=jnp.float32)


def pallas_masked_sums(masks3d, fts3d):
    # masks3d: [NS, 2, hw] bf16, fts3d: [NS, hw, C] bf16  ->  [NS, 2, C] f32
    NS, two, hw = masks3d.shape
    C = fts3d.shape[-1]
    # Batch feature maps per grid step; keep >=2 parallel steps when possible (v7x).
    NB = 1 if NS < 2 else min(8, max(1, NS // 2))
    NS_pad = _round_up(NS, NB)
    # hw reduction tile sized for a <=2 MiB feature tile (safe for v5e's 16 MiB
    # scoped default and v7x's 64 MiB physical VMEM even double-buffered).
    max_thw = max(128, (2 * 1024 * 1024) // max(1, NB * C * fts3d.dtype.itemsize))
    max_thw = (max_thw // 128) * 128
    THW = hw if (hw <= max_thw or hw <= 128) else max_thw
    hw_pad = _round_up(hw, THW)
    if NS_pad != NS or hw_pad != hw:
        masks3d = jnp.pad(masks3d, ((0, NS_pad - NS), (0, 0), (0, hw_pad - hw)))
        fts3d = jnp.pad(fts3d, ((0, NS_pad - NS), (0, hw_pad - hw), (0, 0)))
    out = pl.pallas_call(
        masked_sum_kernel,
        out_shape=jax.ShapeDtypeStruct((NS_pad, two, C), jnp.float32),
        grid=(NS_pad // NB, hw_pad // THW),
        in_specs=[
            pl.BlockSpec((NB, two, THW), lambda n, k: (n, 0, k)),
            pl.BlockSpec((NB, THW, C), lambda n, k: (n, k, 0)),
        ],
        out_specs=pl.BlockSpec((NB, two, C), lambda n, k: (n, 0, 0)),
        compiler_params=pltpu.CompilerParams(
            dimension_semantics=("parallel", "arbitrary")),
    )(masks3d, fts3d)
    return out[:NS]


def caldist_kernel(q_ref, p_ref, o_ref, *, n_cls, num_cnt):
    # q_ref: [1, TP, C] bf16 query pixels, p_ref: [1, C, Ktot] bf16 normalized
    # prototypes (pre-transposed); o_ref: [1, TP, n_cls] f32 = 20 * per-class max
    # cosine similarity.
    q = q_ref[0].astype(jnp.float32)                                    # [TP, C]
    qn = q * lax.rsqrt(
        jnp.maximum(jnp.sum(q * q, axis=-1, keepdims=True), 1e-16))
    sims = jnp.dot(qn.astype(jnp.bfloat16), p_ref[0],
                   preferred_element_type=jnp.float32)                  # [TP, Ktot]
    cls_max = [
        jnp.max(sims[:, c * num_cnt:(c + 1) * num_cnt], axis=-1, keepdims=True)
        for c in range(n_cls)
    ]
    o_ref[0] = 20.0 * jnp.concatenate(cls_max, axis=-1)                 # [TP, n_cls]


def pallas_caldist(q3d, protos_t, n_cls, num_cnt):
    # q3d: [B, P, C] bf16, protos_t: [B, C, Ktot] bf16 -> [B, P, n_cls] f32
    B, P, C = q3d.shape
    Ktot = protos_t.shape[-1]
    TP = _pick_tile(P, 2048, 128)
    P_pad = _round_up(P, TP)
    if P_pad != P:
        q3d = jnp.pad(q3d, ((0, 0), (0, P_pad - P), (0, 0)))
    kern = functools.partial(caldist_kernel, n_cls=n_cls, num_cnt=num_cnt)
    out = pl.pallas_call(
        kern,
        out_shape=jax.ShapeDtypeStruct((B, P_pad, n_cls), jnp.float32),
        grid=(B, P_pad // TP),
        in_specs=[
            pl.BlockSpec((1, TP, C), lambda b, i: (b, i, 0)),
            pl.BlockSpec((1, C, Ktot), lambda b, i: (b, 0, 0)),
        ],
        out_specs=pl.BlockSpec((1, TP, n_cls), lambda b, i: (b, i, 0)),
        compiler_params=pltpu.CompilerParams(
            dimension_semantics=("parallel", "parallel")),
    )(q3d, protos_t)
    return out[:, :P]


# ----------------------------------------------------------------------------
# Plain-JAX glue: resize matrices, nearest resize, weighted k-means, patchify
# ----------------------------------------------------------------------------
def bilinear_weight_matrix(out_size, in_size):
    """W[out, in]: (W @ v) = align_corners=True bilinear 1-D resize of v."""
    if out_size > 1:
        src = jnp.linspace(0.0, in_size - 1.0, out_size)
    else:
        src = jnp.zeros((out_size,), jnp.float32)
    i0 = jnp.clip(jnp.floor(src).astype(jnp.int32), 0, in_size - 1)
    i1 = jnp.clip(i0 + 1, 0, in_size - 1)
    w = src - i0.astype(jnp.float32)
    return (jax.nn.one_hot(i0, in_size, dtype=jnp.float32) * (1.0 - w)[:, None]
            + jax.nn.one_hot(i1, in_size, dtype=jnp.float32) * w[:, None])


def nearest_resize(x, out_hw):
    """F.interpolate(mode='nearest') on the last two dims (masks only, small)."""
    H, W = x.shape[-2:]
    oh, ow = out_hw
    yi = (jnp.arange(oh) * H) // oh
    xi = (jnp.arange(ow) * W) // ow
    return x[..., yi, :][..., :, xi]


def weighted_kmeans(points, weights, num_cnt, iters=10):
    """Deterministic weighted Lloyd k-means (stand-in for KmeansClustering).

    points: [N, C] f32, weights: [N] (0/1 mask weights) -> centers [num_cnt, C]
    # TODO(synk): the original KmeansClustering (init='random', boolean-indexed
    # point subsets) is not provided; deterministic evenly-spaced init + mask
    # weights replace the data-dependent-shape boolean indexing.
    """
    N, C = points.shape
    init_idx = (jnp.arange(num_cnt) * (N // max(num_cnt, 1))) % N
    centers0 = points[init_idx]

    def body(_, centers):
        # ||c||^2 - 2 p.c  (||p||^2 constant wrt argmin) — matmul form, no
        # [N, K, C] broadcast intermediate.
        c_sq = jnp.sum(centers * centers, axis=-1)
        d = c_sq[None, :] - 2.0 * (points @ centers.T)
        assign = jnp.argmin(d, axis=-1)
        onehot = jax.nn.one_hot(assign, num_cnt, dtype=points.dtype) * weights[:, None]
        counts = onehot.sum(0)
        new_c = (onehot.T @ points) / (counts[:, None] + 1e-5)
        return jnp.where(counts[:, None] > 0, new_c, centers)

    return lax.fori_loop(0, iters, body, centers0)


def patchify(imgs, s):
    B, C, H, W = imgs.shape
    x = imgs.reshape(B, C, H // s, s, W // s, s)
    x = jnp.transpose(x, (0, 2, 4, 1, 3, 5))
    return x.reshape(B * (H // s) * (W // s), C * s * s)


# ----------------------------------------------------------------------------
# Forward pass (inference path: training branches inactive, as in the reference)
# ----------------------------------------------------------------------------
def few_shot_seg_part_forward(supp_imgs, fore_mask, back_mask, qry_imgs,
                              enc_w, enc_b, num_cnt):
    """
    supp_imgs: [n_ways, n_shots, B, 3, H, W]
    fore_mask: [n_ways, n_shots, B, H, W]
    back_mask: [n_ways, n_shots, B, H, W]
    qry_imgs:  [n_queries, B, 3, H, W]
    """
    n_ways, n_shots, B, _, H, W = supp_imgs.shape
    n_queries = qry_imgs.shape[0]
    s = ENC_STRIDE
    hp, wp = H // s, W // s
    hw = hp * wp
    n_cls = 1 + n_ways
    NS = n_ways * n_shots * B
    Cf = enc_w.shape[1]

    # --- encoder (synthetic stand-in for resnet50Sem: stride-4 patch conv) ---
    # TODO(synk): resnet50Sem / _ASPP are external modules; a deterministic
    # stride-4 patch projection replaces the backbone; the semantic branch is
    # None in eval mode exactly as in the reference.
    supp_flat = supp_imgs.reshape(NS, 3, H, W)
    qry_flat = qry_imgs.reshape(n_queries * B, 3, H, W)
    imgs_concat = jnp.concatenate([supp_flat, qry_flat], axis=0)
    patches = patchify(imgs_concat.astype(jnp.bfloat16), s)   # [Btot*hw, 3*s*s]
    feats = pallas_linproj(patches, enc_w.astype(jnp.bfloat16),
                           enc_b.astype(jnp.float32))         # bf16 [Btot*hw, Cf]
    Btot = imgs_concat.shape[0]
    img_fts = feats.reshape(Btot, hp, wp, Cf)                 # channels-last, bf16

    supp_fts = img_fts[:NS]                                   # [NS, hp, wp, Cf]
    qry_fts = img_fts[NS:].reshape(n_queries, B, hp, wp, Cf)

    # ------------------------------------------------------------------------
    # (1) Masked average pooling for every (way, shot, epi) x {fg, bg} in ONE
    #     Pallas call.  Pooling happens at feature resolution using transposed
    #     bilinear weights (exactly equivalent to pooling the bilinear-upsampled
    #     features against the full-res mask) — no [H*W, C] slab.
    # ------------------------------------------------------------------------
    fts3d = supp_fts.reshape(NS, hw, Cf)                      # bf16, no transpose
    U_y = bilinear_weight_matrix(H, hp)                       # [H, hp]
    U_x = bilinear_weight_matrix(W, wp)                       # [W, wp]
    fg_flat = fore_mask.reshape(NS, H, W).astype(jnp.float32)
    bg_flat = back_mask.reshape(NS, H, W).astype(jnp.float32)
    fg_down = jnp.einsum('yi,nyx,xj->nij', U_y, fg_flat, U_x)      # [NS, hp, wp]
    bg_down = jnp.einsum('yi,nyx,xj->nij', U_y, bg_flat, U_x)
    masks3d = jnp.stack([fg_down.reshape(NS, hw),
                         bg_down.reshape(NS, hw)], axis=1).astype(jnp.bfloat16)

    sums = pallas_masked_sums(masks3d, fts3d)                 # [NS, 2, Cf] f32
    den = jnp.stack([fg_flat.reshape(NS, -1).sum(-1),
                     bg_flat.reshape(NS, -1).sum(-1)], axis=1)     # [NS, 2]
    pooled = (sums / (den[..., None] + 1e-5)).reshape(n_ways, n_shots, B, 2, Cf)
    fg_glo = pooled[..., 0, :].mean(axis=1)                   # [n_ways, B, Cf]
    bg_glo = pooled[..., 1, :].mean(axis=1).mean(axis=0)      # [B, Cf]

    # ------------------------------------------------------------------------
    # (2) Local k-means prototypes (vmapped over way/epi), weighted by masks.
    #     Feature x2 upsample in separable matrix form (MXU), channels-last.
    # TODO(synk): the original falls back to full-resolution features when the
    # upscaled mask has <=10 positives (data-dependent boolean indexing); we
    # always use the upscaled branch with mask weights instead.
    # ------------------------------------------------------------------------
    hu, wu = 2 * hp, 2 * wp
    U2y = bilinear_weight_matrix(hu, hp).astype(jnp.bfloat16)      # [hu, hp]
    U2x = bilinear_weight_matrix(wu, wp)                           # [wu, wp]
    fts_u = jnp.einsum('uy,nyxc->nuxc', U2y, supp_fts,
                       preferred_element_type=jnp.float32)
    fts_u = jnp.einsum('vx,nuxc->nuvc', U2x, fts_u)           # [NS, hu, wu, Cf] f32
    fts_u6 = fts_u.reshape(n_ways, n_shots, B, hu, wu, Cf)
    fg_pts = jnp.transpose(fts_u6, (0, 2, 1, 3, 4, 5)).reshape(
        n_ways, B, n_shots * hu * wu, Cf)
    fg_mask_u = nearest_resize(fore_mask.astype(jnp.float32), (hu, wu))
    fg_wts = jnp.transpose(fg_mask_u, (0, 2, 1, 3, 4)).reshape(
        n_ways, B, n_shots * hu * wu)

    supp6 = supp_fts.reshape(n_ways, n_shots, B, hp, wp, Cf)
    bg_pts = jnp.transpose(supp6, (2, 0, 1, 3, 4, 5)).reshape(
        B, n_ways * n_shots * hw, Cf).astype(jnp.float32)     # bg upscale=1
    bg_mask_d = nearest_resize(back_mask.astype(jnp.float32), (hp, wp))
    bg_wts = jnp.transpose(bg_mask_d, (2, 0, 1, 3, 4)).reshape(
        B, n_ways * n_shots * hw)

    kfn = functools.partial(weighted_kmeans, num_cnt=num_cnt)
    fg_centers = jax.vmap(jax.vmap(kfn))(fg_pts, fg_wts)      # [n_ways, B, K, Cf]
    bg_centers = jax.vmap(kfn)(bg_pts, bg_wts)                # [B, K, Cf]

    fg_protos = fg_centers + GLOBAL_CONST * fg_glo[:, :, None, :]
    bg_proto = bg_centers + GLOBAL_CONST * bg_glo[:, None, :]
    protos = jnp.concatenate(
        [bg_proto[:, None], jnp.transpose(fg_protos, (1, 0, 2, 3))], axis=1)
    protos = protos.reshape(B, n_cls * num_cnt, Cf)           # [B, Ktot, Cf]

    # ------------------------------------------------------------------------
    # (3) calDist: one tiled Pallas call; prototypes pre-normalized + transposed
    #     to [B, Cf, Ktot]; per-class max over num_cnt and the x20 scale are
    #     fused in-kernel; tiny [B, P, n_cls] output (no sims slab read-back).
    # ------------------------------------------------------------------------
    protos_n = protos * lax.rsqrt(
        jnp.maximum(jnp.sum(protos * protos, axis=-1, keepdims=True), 1e-16))
    protos_t = jnp.transpose(protos_n, (0, 2, 1)).astype(jnp.bfloat16)

    P = n_queries * hw
    q3d = jnp.transpose(qry_fts, (1, 0, 2, 3, 4)).reshape(B, P, Cf)   # bf16
    dist = pallas_caldist(q3d, protos_t, n_cls, num_cnt)      # [B, P, n_cls] f32
    pred = jnp.transpose(dist.reshape(B, n_queries, hp, wp, n_cls),
                         (1, 0, 4, 2, 3))                     # [nq, B, n_cls, hp, wp]

    # Final bilinear upsample in separable matrix form (align_corners=True).
    UY = bilinear_weight_matrix(H, hp)
    UX = bilinear_weight_matrix(W, wp)
    out_up = jnp.einsum('Yy,qbcyx->qbcYx', UY, pred)
    out_up = jnp.einsum('Xx,qbcYx->qbcYX', UX, out_up)        # [nq, B, n_cls, H, W]
    output = out_up.reshape(-1, n_cls, H, W)

    output_semantic = None                                    # eval path
    align_loss = jnp.zeros((1,), jnp.float32)                 # eval path
    return output, output_semantic, align_loss


forward_jit = jax.jit(few_shot_seg_part_forward, static_argnums=(6,))


# ----------------------------------------------------------------------------
if __name__ == "__main__":
    key = jax.random.PRNGKey(0)
    n_ways, n_shots, n_queries, B = 1, 1, 1, 2
    H = W = 32
    CFEAT = 128          # synthetic encoder feature channels
    NUM_CNT = 4          # cfg['center'] — kmeans clusters per prototype

    k1, k2, k3, k4, k5 = jax.random.split(key, 5)
    supp_imgs = jax.random.normal(k1, (n_ways, n_shots, B, 3, H, W), jnp.float32)
    qry_imgs = jax.random.normal(k2, (n_queries, B, 3, H, W), jnp.float32)
    fore_mask = (jax.random.uniform(k3, (n_ways, n_shots, B, H, W)) > 0.5
                 ).astype(jnp.float32)
    back_mask = 1.0 - fore_mask

    # deterministic synthetic encoder parameters (conv k=4, s=4, 3 -> CFEAT)
    enc_w = jax.random.normal(k4, (3 * ENC_STRIDE * ENC_STRIDE, CFEAT),
                              jnp.float32) * 0.05
    enc_b = jax.random.normal(k5, (1, CFEAT), jnp.float32) * 0.01

    out, out_sem, align_loss = forward_jit(
        supp_imgs, fore_mask, back_mask, qry_imgs, enc_w, enc_b, NUM_CNT)
    jax.block_until_ready(out)
    jax.block_until_ready(align_loss)

    assert out.shape == (n_queries * B, 1 + n_ways, H, W), out.shape
    assert out_sem is None
    assert bool(jnp.all(jnp.isfinite(out)))
    print("KERNEL_OK")
</pallas_src>

<mosaic_0001>
module attributes {stable_mosaic.version = 11 : i64} {
  func.func @linproj_kernel(%arg0: i32, %arg1: memref<128x48xbf16, #tpu.memory_space<vmem>>, %arg2: memref<48x128xbf16, #tpu.memory_space<vmem>>, %arg3: memref<1x128xf32, #tpu.memory_space<vmem>>, %arg4: memref<128x128xbf16, #tpu.memory_space<vmem>>) attributes {dimension_semantics = [#tpu.dimension_semantics<parallel>], iteration_bounds = array<i64: 2>, scalar_prefetch = 0 : i64, scratch_operands = 0 : i64, tpu.core_type = #tpu.core_type<tc>, window_params = [{transform_indices = @transform_0, window_bounds = array<i64: 128, 48>}, {pipeline_mode = #tpu.pipeline_mode<synchronous>, transform_indices = @transform_1, window_bounds = array<i64: 48, 128>}, {pipeline_mode = #tpu.pipeline_mode<synchronous>, transform_indices = @transform_2, window_bounds = array<i64: 1, 128>}, {transform_indices = @transform_3, window_bounds = array<i64: 128, 128>}]} {
    %c0 = arith.constant 0 : index
    %c0_0 = arith.constant 0 : index
    %0 = vector.load %arg1[%c0, %c0_0] : memref<128x48xbf16, #tpu.memory_space<vmem>>, vector<128x48xbf16>
    %c0_1 = arith.constant 0 : index
    %c0_2 = arith.constant 0 : index
    %1 = vector.load %arg2[%c0_1, %c0_2] : memref<48x128xbf16, #tpu.memory_space<vmem>>, vector<48x128xbf16>
    %cst = arith.constant dense<0.000000e+00> : vector<128x128xf32>
    %2 = tpu.matmul %0, %1, %cst {dimension_numbers = #tpu.dot_dimension_numbers<[1], [0], [0], [1], [0, 0, 1, 1], [], []>} : vector<128x48xbf16>, vector<48x128xbf16>, vector<128x128xf32> -> vector<128x128xf32>
    %c0_3 = arith.constant 0 : index
    %c0_4 = arith.constant 0 : index
    %3 = vector.load %arg3[%c0_3, %c0_4] : memref<1x128xf32, #tpu.memory_space<vmem>>, vector<1x128xf32>
    %4 = vector.broadcast %3 : vector<1x128xf32> to vector<128x128xf32>
    %5 = arith.addf %2, %4 : vector<128x128xf32>
    %6 = arith.truncf %5 : vector<128x128xf32> to vector<128x128xbf16>
    %c0_5 = arith.constant 0 : index
    %c0_6 = arith.constant 0 : index
    %7 = vector.load %arg4[%c0_5, %c0_6] : memref<128x128xbf16, #tpu.memory_space<vmem>>, vector<128x128xbf16>
    tpu.vector_store %arg4[%c0_5, %c0_6], %6 {strides = array<i32>} : memref<128x128xbf16, #tpu.memory_space<vmem>>, vector<128x128xbf16>,
    return
  }
  func.func @transform_0(%arg0: i32) -> (i32, i32) {
    %c0_i32 = arith.constant 0 : i32
    %c0_i32_0 = arith.constant 0 : i32
    return %arg0, %c0_i32 : i32, i32
  }
  func.func @transform_1(%arg0: i32) -> (i32, i32) {
    %c0_i32 = arith.constant 0 : i32
    %c0_i32_0 = arith.constant 0 : i32
    %c0_i32_1 = arith.constant 0 : i32
    return %c0_i32, %c0_i32_0 : i32, i32
  }
  func.func @transform_2(%arg0: i32) -> (i32, i32) {
    %c0_i32 = arith.constant 0 : i32
    %c0_i32_0 = arith.constant 0 : i32
    %c0_i32_1 = arith.constant 0 : i32
    return %c0_i32, %c0_i32_0 : i32, i32
  }
  func.func @transform_3(%arg0: i32) -> (i32, i32) {
    %c0_i32 = arith.constant 0 : i32
    %c0_i32_0 = arith.constant 0 : i32
    return %arg0, %c0_i32 : i32, i32
  }
}

module attributes {stable_mosaic.version = 11 : i64} {
  func.func @masked_sum_kernel(%arg0: i32, %arg1: i32, %arg2: memref<1x2x64xbf16, #tpu.memory_space<vmem>>, %arg3: memref<1x64x128xbf16, #tpu.memory_space<vmem>>, %arg4: memref<1x2x128xf32, #tpu.memory_space<vmem>>) attributes {dimension_semantics = [#tpu.dimension_semantics<parallel>, #tpu.dimension_semantics<arbitrary>], iteration_bounds = array<i64: 2, 1>, scalar_prefetch = 0 : i64, scratch_operands = 0 : i64, tpu.core_type = #tpu.core_type<tc>, window_params = [{transform_indices = @transform_0, window_bounds = array<i64: 1, 2, 64>}, {transform_indices = @transform_1, window_bounds = array<i64: 1, 64, 128>}, {transform_indices = @transform_2, window_bounds = array<i64: 1, 2, 128>}]} {
    %c0_i32 = arith.constant 0 : i32
    %0 = arith.cmpi eq, %arg1, %c0_i32 : i32
    %1 = arith.extui %0 : i1 to i32
    %c0_i32_0 = arith.constant 0 : i32
    %2 = arith.cmpi ne, %1, %c0_i32_0 : i32
    scf.if %2 {
      %cst_12 = arith.constant 0.000000e+00 : f32
      %9 = vector.broadcast %cst_12 : f32 to vector<1x2x128xf32>
      %c0_13 = arith.constant 0 : index
      %c0_14 = arith.constant 0 : index
      %c0_15 = arith.constant 0 : index
      %10 = vector.load %arg4[%c0_13, %c0_14, %c0_15] : memref<1x2x128xf32, #tpu.memory_space<vmem>>, vector<1x2x128xf32>
      tpu.vector_store %arg4[%c0_13, %c0_14, %c0_15], %9 {strides = array<i32>} : memref<1x2x128xf32, #tpu.memory_space<vmem>>, vector<1x2x128xf32>,
    } else {
    }
    %c0 = arith.constant 0 : index
    %c0_1 = arith.constant 0 : index
    %c0_2 = arith.constant 0 : index
    %3 = vector.load %arg4[%c0, %c0_1, %c0_2] : memref<1x2x128xf32, #tpu.memory_space<vmem>>, vector<1x2x128xf32>
    %c0_3 = arith.constant 0 : index
    %c0_4 = arith.constant 0 : index
    %c0_5 = arith.constant 0 : index
    %4 = vector.load %arg2[%c0_3, %c0_4, %c0_5] : memref<1x2x64xbf16, #tpu.memory_space<vmem>>, vector<1x2x64xbf16>
    %c0_6 = arith.constant 0 : index
    %c0_7 = arith.constant 0 : index
    %c0_8 = arith.constant 0 : index
    %5 = vector.load %arg3[%c0_6, %c0_7, %c0_8] : memref<1x64x128xbf16, #tpu.memory_space<vmem>>, vector<1x64x128xbf16>
    "tpu.trace_start"() <{level = 10 : i32, message = "nkh,nhc->nkc"}> : () -> ()
    %cst = arith.constant dense<0.000000e+00> : vector<1x2x128xf32>
    %6 = tpu.matmul %4, %5, %cst {dimension_numbers = #tpu.dot_dimension_numbers<[2], [1], [1], [2], [0, 0, 0, 1, 1, 2], [0], [0]>} : vector<1x2x64xbf16>, vector<1x64x128xbf16>, vector<1x2x128xf32> -> vector<1x2x128xf32>
    "tpu.trace_stop"() : () -> ()
    %7 = arith.addf %3, %6 : vector<1x2x128xf32>
    %c0_9 = arith.constant 0 : index
    %c0_10 = arith.constant 0 : index
    %c0_11 = arith.constant 0 : index
    %8 = vector.load %arg4[%c0_9, %c0_10, %c0_11] : memref<1x2x128xf32, #tpu.memory_space<vmem>>, vector<1x2x128xf32>
    tpu.vector_store %arg4[%c0_9, %c0_10, %c0_11], %7 {strides = array<i32>} : memref<1x2x128xf32, #tpu.memory_space<vmem>>, vector<1x2x128xf32>,
    return
  }
  func.func @transform_0(%arg0: i32, %arg1: i32) -> (i32, i32, i32) {
    %c0_i32 = arith.constant 0 : i32
    %c0_i32_0 = arith.constant 0 : i32
    return %arg0, %c0_i32, %arg1 : i32, i32, i32
  }
  func.func @transform_1(%arg0: i32, %arg1: i32) -> (i32, i32, i32) {
    %c0_i32 = arith.constant 0 : i32
    %c0_i32_0 = arith.constant 0 : i32
    return %arg0, %arg1, %c0_i32 : i32, i32, i32
  }
  func.func @transform_2(%arg0: i32, %arg1: i32) -> (i32, i32, i32) {
    %c0_i32 = arith.constant 0 : i32
    %c0_i32_0 = arith.constant 0 : i32
    %c0_i32_1 = arith.constant 0 : i32
    return %arg0, %c0_i32, %c0_i32_0 : i32, i32, i32
  }
}

module attributes {stable_mosaic.version = 11 : i64} {
  func.func @caldist_kernel(%arg0: i32, %arg1: i32, %arg2: memref<1x128x128xbf16, #tpu.memory_space<vmem>>, %arg3: memref<1x128x8xbf16, #tpu.memory_space<vmem>>, %arg4: memref<1x128x2xf32, #tpu.memory_space<vmem>>) attributes {dimension_semantics = [#tpu.dimension_semantics<parallel>, #tpu.dimension_semantics<parallel>], iteration_bounds = array<i64: 2, 1>, scalar_prefetch = 0 : i64, scratch_operands = 0 : i64, tpu.core_type = #tpu.core_type<tc>, window_params = [{transform_indices = @transform_0, window_bounds = array<i64: 1, 128, 128>}, {transform_indices = @transform_1, window_bounds = array<i64: 1, 128, 8>}, {transform_indices = @transform_2, window_bounds = array<i64: 1, 128, 2>}]} {
    %c0 = arith.constant 0 : index
    %c0_0 = arith.constant 0 : index
    %c0_1 = arith.constant 0 : index
    %0 = vector.load %arg2[%c0, %c0_0, %c0_1] : memref<1x128x128xbf16, #tpu.memory_space<vmem>>, vector<1x128x128xbf16>
    %1 = vector.shape_cast %0 : vector<1x128x128xbf16> to vector<128x128xbf16>
    %2 = arith.extf %1 : vector<128x128xbf16> to vector<128x128xf32>
    %3 = arith.mulf %2, %2 : vector<128x128xf32>
    %cst = arith.constant dense<0.000000e+00> : vector<128xf32>
    %4 = vector.multi_reduction <add>, %3, %cst [1] : vector<128x128xf32> to vector<128xf32>
    %5 = vector.shape_cast %4 : vector<128xf32> to vector<128x1xf32>
    %cst_2 = arith.constant 1.000000e-16 : f32
    %6 = vector.broadcast %cst_2 : f32 to vector<128x1xf32>
    %7 = arith.maximumf %5, %6 : vector<128x1xf32>
    %8 = math.rsqrt %7 : vector<128x1xf32>
    %9 = vector.broadcast %8 : vector<128x1xf32> to vector<128x128xf32>
    %10 = arith.mulf %2, %9 : vector<128x128xf32>
    %11 = arith.truncf %10 : vector<128x128xf32> to vector<128x128xbf16>
    %c0_3 = arith.constant 0 : index
    %c0_4 = arith.constant 0 : index
    %c0_5 = arith.constant 0 : index
    %12 = vector.load %arg3[%c0_3, %c0_4, %c0_5] : memref<1x128x8xbf16, #tpu.memory_space<vmem>>, vector<1x128x8xbf16>
    %13 = vector.shape_cast %12 : vector<1x128x8xbf16> to vector<128x8xbf16>
    %cst_6 = arith.constant dense<0.000000e+00> : vector<128x8xf32>
    %14 = tpu.matmul %11, %13, %cst_6 {dimension_numbers = #tpu.dot_dimension_numbers<[1], [0], [0], [1], [0, 0, 1, 1], [], []>} : vector<128x128xbf16>, vector<128x8xbf16>, vector<128x8xf32> -> vector<128x8xf32>
    %15 = vector.extract_strided_slice %14 {offsets = [0, 0], sizes = [128, 4], strides = [1, 1]} : vector<128x8xf32> to vector<128x4xf32>
    %cst_7 = arith.constant dense<0xFF800000> : vector<128xf32>
    %16 = vector.multi_reduction <maximumf>, %15, %cst_7 [1] : vector<128x4xf32> to vector<128xf32>
    %17 = vector.shape_cast %16 : vector<128xf32> to vector<128x1xf32>
    %18 = vector.extract_strided_slice %14 {offsets = [0, 4], sizes = [128, 4], strides = [1, 1]} : vector<128x8xf32> to vector<128x4xf32>
    %cst_8 = arith.constant dense<0xFF800000> : vector<128xf32>
    %19 = vector.multi_reduction <maximumf>, %18, %cst_8 [1] : vector<128x4xf32> to vector<128xf32>
    %20 = vector.shape_cast %19 : vector<128xf32> to vector<128x1xf32>
    %21 = tpu.concatenate %17, %20 in 1 : vector<128x1xf32>, vector<128x1xf32> -> vector<128x2xf32>
    %cst_9 = arith.constant 2.000000e+01 : f32
    %22 = vector.broadcast %cst_9 : f32 to vector<128x2xf32>
    %23 = arith.mulf %22, %21 : vector<128x2xf32>
    %c0_10 = arith.constant 0 : index
    %c0_11 = arith.constant 0 : index
    %c0_12 = arith.constant 0 : index
    %24 = vector.load %arg4[%c0_10, %c0_11, %c0_12] : memref<1x128x2xf32, #tpu.memory_space<vmem>>, vector<1x128x2xf32>
    %25 = vector.shape_cast %24 : vector<1x128x2xf32> to vector<128x2xf32>
    %26 = vector.shape_cast %23 : vector<128x2xf32> to vector<1x128x2xf32>
    tpu.vector_store %arg4[%c0_10, %c0_11, %c0_12], %26 {strides = array<i32>} : memref<1x128x2xf32, #tpu.memory_space<vmem>>, vector<1x128x2xf32>,
    return
  }
  func.func @transform_0(%arg0: i32, %arg1: i32) -> (i32, i32, i32) {
    %c0_i32 = arith.constant 0 : i32
    %c0_i32_0 = arith.constant 0 : i32
    return %arg0, %arg1, %c0_i32 : i32, i32, i32
  }
  func.func @transform_1(%arg0: i32, %arg1: i32) -> (i32, i32, i32) {
    %c0_i32 = arith.constant 0 : i32
    %c0_i32_0 = arith.constant 0 : i32
    %c0_i32_1 = arith.constant 0 : i32
    return %arg0, %c0_i32, %c0_i32_0 : i32, i32, i32
  }
  func.func @transform_2(%arg0: i32, %arg1: i32) -> (i32, i32, i32) {
    %c0_i32 = arith.constant 0 : i32
    %c0_i32_0 = arith.constant 0 : i32
    return %arg0, %arg1, %c0_i32 : i32, i32, i32
  }
}

</mosaic_0001>

<bundles_post_ra>
// kernel: few_shot_seg_part_forward.3
= control target key start
LH: loop header
LB: loop body
LE: loop exit
PB: predicated region body
PF: predicated region fallthrough
CT: control target
= control target key end

     0   :  { %s716_s12 = smov 0   ;;  %s770_s0 = inlined_call_operand.vmem [shape: bf16[256,48], index: 0, kind: input, shape index: {}]   ;;  %s771_s1 = inlined_call_operand.vmem [shape: bf16[48,128], index: 1, kind: input, shape index: {}]   ;;  %s772_s2 = inlined_call_operand.vmem [shape: f32[1,128], index: 2, kind: input, shape index: {}]   ;;  %s773_s3 = inlined_call_operand.vmem [shape: bf16[256,128], index: 3, kind: output, shape index: {}]  }
   0x1 LB: > { %s520_s13 = sadd.s32 4294967295, %s694_s12   ;;  %p524_p0 = scmp.ge.s32.totalorder %s694_s12, 1  ;;  %s694_s12 = sphi %s716_s12, %s13_s12  }
   0x2   : > { %p138_p1 = scmp.lt.s32.totalorder %s694_s12, 3 }
   0x4   : > { %p139_p2 = pnand %p524_p0, %p138_p1 }
   0x5   : > { %v677_v0 = vld [vmem:[%s771_s1] sm:$0xff] (!%p139_p2)   ;;  %s525_s16 = sshll.u32 (!%p139_p2), %s520_s13, 4  ;;  %v678_v1 = vld [vmem:[%s771_s1 + $0x8] sm:$0xff] (!%p139_p2)   ;;  %v679_v2 = vld [vmem:[%s771_s1 + $0x10] sm:$0xff] (!%p139_p2)   ;;  %vm262_vm0 = vcmask (!%p139_p2), 392192  }
   0x6   : > { %142 = sbr.rel (%p139_p2) target bundleno = 247 (0xf7), region = 32  ;;  %p163_p3 = scmp.lt.s32.totalorder (!%p139_p2), %s525_s16, 31  ;;  %641 = vmatprep.subr.bf16.mxu0 (!%p139_p2), %v677_v0  ;;  %663 = vmatprep.subr.bf16.mxu1 (!%p139_p2), %v677_v0  ;;  %v529_v12 = vld [vmem:[%s772_s2] ss:$0 sm:$0xff] (!%p139_p2) }
   0x7   : > { %642 = vmatpush3.bf16.msra.mxu0 (!%p139_p2), %v677_v0  ;;  %666 = vmatpush3.bf16.msra.mxu1 (!%p139_p2), %v677_v0 }
   0x8   : > { %643 = vmatprep.subr.bf16.mxu0 (!%p139_p2), %v678_v1  ;;  %664 = vmatprep.subr.bf16.mxu1 (!%p139_p2), %v678_v1 }
   0xb   : > { %644 = vmatpush3.bf16.msra.mxu0 (!%p139_p2), %v678_v1  ;;  %667 = vmatpush3.bf16.msra.mxu1 (!%p139_p2), %v678_v1 }
   0xc   : > { %645 = vmatprep.subr.bf16.mxu0 (!%p139_p2), %v679_v2  ;;  %665 = vmatprep.subr.bf16.mxu1 (!%p139_p2), %v679_v2 }
   0xd   : > { %s775_s16 = smov (!%p163_p3, %s525_s16), 31 }
   0xe   : > { %s526_s21 = sshll.u32 %s775_s16, 2 }
   0xf   : > { %s166_s24 = scalar_lea.vmem %s770_s0, %s526_s21  ;;  %646 = vmatpush3.bf16.msra.mxu0 %v679_v2  ;;  %668 = vmatpush3.bf16.msra.mxu1 %v679_v2  ;;  %s757_s29 = scalar_lea.vmem %s773_s3, %s526_s21 }
  0x10   : > { %v680_v3 = vld [vmem:[%s166_s24] sm:$0xff]   ;;  %v682_v5 = vld [vmem:[%s166_s24 + $0x8] sm:$0xff]   ;;  %v684_v7 = vld [vmem:[%s166_s24 + $0x10] sm:$0xff]  }
  0x11   : > { %v681_v4 = vld [vmem:[%s166_s24 + $0x20] sm:$0xff]   ;;  %647 = vmatprep.mubr.msk.bf16.mxu0 %vm262_vm0, %v680_v3  ;;  %v683_v6 = vld [vmem:[%s166_s24 + $0x28] sm:$0xff]   ;;  %v685_v8 = vld [vmem:[%s166_s24 + $0x30] sm:$0xff]  }
  0x12   : > { %655 = vmatprep.mubr.msk.bf16.mxu1 %vm262_vm0, %v681_v4  ;;  %648 = vmatmul.mubr.msk.bf16.vlgmr.msra.gmra.mrb[0].mxu0 %vm262_vm0, %v682_v5  ;;  %v686_v9 = vld [vmem:[%s166_s24 + $0x18] sm:$0xff]  }
  0x13   : > { %656 = vmatmul.mubr.msk.bf16.vlgmr.msra.gmra.mrb[0].mxu1 %vm262_vm0, %v683_v6  ;;  %651 = vmatprep.mubr.msk.bf16.mxu0 %vm262_vm0, %v684_v7  ;;  %v687_v10 = vld [vmem:[%s166_s24 + $0x38] sm:$0xff]  }
  0x14   : > { %659 = vmatprep.mubr.msk.bf16.mxu1 %vm262_vm0, %v685_v8 }
  0x1a   : > { %652 = vmatmul.mubr.msk.bf16.gmra.mrb[4].mxu0 %vm262_vm0, %v686_v9 }
  0x1b   : > { %660 = vmatmul.mubr.msk.bf16.gmra.mrb[4].mxu1 %vm262_vm0, %v687_v10 }
  0xe5   : > { %v649_v11 = vpop.f32.mrb[0].mxu0 }
  0xe6   : > { %v657_v13 = vpop.f32.mrb[0].mxu1  ;;  %v321_v14 = vpop.f32.mrb[1].mxu0  ;;  %v330_v18 = vadd.f32 %v649_v11, %v529_v12 }
  0xe7   : > { %v353_v15 = vpop.f32.mrb[1].mxu1  ;;  %v650_v16 = vpop.f32.mrb[2].mxu0  ;;  %v362_v19 = vadd.f32 %v657_v13, %v529_v12  ;;  %v322_v24 = vadd.f32 %v529_v12, %v321_v14 }
  0xe8   : > { %v658_v17 = vpop.f32.mrb[2].mxu1  ;;  %v333_v20 = vadd.f32 %v650_v16, %v529_v12  ;;  %v324_v22 = vpop.f32.mrb[3].mxu0  ;;  %v354_v25 = vadd.f32 %v529_v12, %v353_v15 }
  0xe9   : > { %v365_v21 = vadd.f32 %v658_v17, %v529_v12  ;;  %v356_v23 = vpop.f32.mrb[3].mxu1  ;;  %v325_v26 = vadd.f32 %v529_v12, %v324_v22 }
  0xea   : > { %v357_v27 = vadd.f32 %v529_v12, %v356_v23  ;;  %v591_v28 = vpack.c.bf16 %v333_v20, %v330_v18 }
  0xeb   : > { %v611_v29 = vpack.c.bf16 %v365_v21, %v362_v19  ;;  %v586_v30 = vpack.c.bf16 %v325_v26, %v322_v24 }
  0xec   : > { %v606_v31 = vpack.c.bf16 %v357_v27, %v354_v25  ;;  %623 = vst [vmem:[%s757_s29 + $0x8] sm:$0xff] %v591_v28  }
  0xed   : > { %627 = vst [vmem:[%s757_s29 + $0x28] sm:$0xff] %v611_v29   ;;  %587 = vst [vmem:[%s757_s29] sm:$0xff] %v586_v30   ;;  %v653_v32 = vpop.f32.mrb[4].mxu0 }
  0xee   : > { %626 = vst [vmem:[%s757_s29 + $0x20] sm:$0xff] %v606_v31   ;;  %v661_v33 = vpop.f32.mrb[4].mxu1  ;;  %v337_v34 = vpop.f32.mrb[5].mxu0  ;;  %v346_v38 = vadd.f32 %v653_v32, %v529_v12 }
  0xef   : > { %v369_v35 = vpop.f32.mrb[5].mxu1  ;;  %v654_v36 = vpop.f32.mrb[6].mxu0  ;;  %v378_v39 = vadd.f32 %v661_v33, %v529_v12  ;;  %v338_v44 = vadd.f32 %v529_v12, %v337_v34 }
  0xf0   : > { %v662_v37 = vpop.f32.mrb[6].mxu1  ;;  %v349_v40 = vadd.f32 %v654_v36, %v529_v12  ;;  %v340_v42 = vpop.f32.mrb[7].mxu0  ;;  %v370_v45 = vadd.f32 %v529_v12, %v369_v35 }
  0xf1   : > { %v381_v41 = vadd.f32 %v662_v37, %v529_v12  ;;  %v372_v43 = vpop.f32.mrb[7].mxu1  ;;  %v341_v46 = vadd.f32 %v529_v12, %v340_v42 }
  0xf2   : > { %v373_v47 = vadd.f32 %v529_v12, %v372_v43  ;;  %v601_v48 = vpack.c.bf16 %v349_v40, %v346_v38 }
  0xf3   : > { %v621_v49 = vpack.c.bf16 %v381_v41, %v378_v39  ;;  %v596_v50 = vpack.c.bf16 %v341_v46, %v338_v44 }
  0xf4   : > { %v616_v51 = vpack.c.bf16 %v373_v47, %v370_v45  ;;  %625 = vst [vmem:[%s757_s29 + $0x18] sm:$0xff] %v601_v48  }
  0xf5   : > { %629 = vst [vmem:[%s757_s29 + $0x38] sm:$0xff] %v621_v49   ;;  %624 = vst [vmem:[%s757_s29 + $0x10] sm:$0xff] %v596_v50  }
  0xf6   : > { %628 = vst [vmem:[%s757_s29 + $0x30] sm:$0xff] %v616_v51  }
  0xf7 PF: > { %s13_s12 = sadd.s32 1, %s694_s12  }
  0xf8   : > { %p10_p4 = scmp.ge.s32.totalorder %s13_s12, 4  }
  0xfa   :  { %12 = sbr.rel (!%p10_p4) target bundleno = 1 (0x1), region = 62 }

// kernel: few_shot_seg_part_forward.4
= control target key start
LH: loop header
LB: loop body
LE: loop exit
PB: predicated region body
PF: predicated region fallthrough
CT: control target
= control target key end

     0   :  { %s464_s9 = smov 0   ;;  %s466_s10 = smov 0   ;;  %s500_s0 = inlined_call_operand.vmem [shape: bf16[2,2,64], index: 0, kind: input, shape index: {}]   ;;  %s501_s1 = inlined_call_operand.vmem [shape: bf16[2,64,128], index: 1, kind: input, shape index: {}]   ;;  %s502_s2 = inlined_call_operand.vmem [shape: f32[2,2,128], index: 2, kind: output, shape index: {}]  }
   0x1   :  { %s468_s11 = smov 0  }
   0x2 LB: > { %s24_s12 = sadd.s32 1, %s441_s10  ;;  %p364_p0 = scmp.ge.s32.totalorder %s445_s11, 1  ;;  %s445_s11 = sphi %s468_s11, %s12_s11   ;;  %s441_s10 = sphi %s466_s10, %s504_s10   ;;  %s437_s9 = sphi %s464_s9, %s503_s9  }
   0x3   : > { %p26_p1 = scmp.ge.s32.totalorder %s24_s12, 2  ;;  %p144_p2 = scmp.lt.s32.totalorder %s445_s11, 3 }
   0x5   : > { %s506_s12 = smov (%p26_p1, %s24_s12), 0  ;;  %p145_p3 = pnand %p364_p0, %p144_p2 }
   0x6   : > { %p175_p4 = scmp.lt.s32.totalorder (!%p145_p3), %s437_s9, 1  ;;  %v447_v0 = vmov (!%p145_p3), 0.0   ;;  %vm448_vm0 = vmmov (!%p145_p3), 0   ;;  %vm235_vm1 = vcmask (!%p145_p3), 523264  }
   0x7   : > { %148 = sbr.rel (%p145_p3) target bundleno = 248 (0xf8), region = 28  ;;  %381 = vmatprep.subr.bf16.mxu0 (!%p145_p3), %v447_v0  ;;  %389 = vmatprep.mubr.msk.bf16.mxu0 (!%p145_p3), %vm448_vm0, %v447_v0 }
   0xe   : > { %s508_s9 = smov (!%p175_p4, %s437_s9), 1 }
   0xf   : > { %s375_s13 = sshll.u32 %s508_s9, 5  ;;  %s367_s17 = sshll.u32 %s508_s9, 1 }
  0x10   : > { %s189_s16 = scalar_lea.vmem %s501_s1, %s375_s13  ;;  %s194_s20 = scalar_lea.vmem %s502_s2, %s367_s17 }
  0x11   : > { %v419_v1 = vld [vmem:[%s189_s16] sm:$0xff]   ;;  %200 = vst [vmem:[%s194_s20] sm:$0x3] %v447_v0  ;;  %v420_v2 = vld [vmem:[%s189_s16 + $0x8] sm:$0xff]   ;;  %v421_v3 = vld [vmem:[%s189_s16 + $0x10] sm:$0xff]   ;;  %s180_s23 = scalar_lea.vmem %s500_s0, %s508_s9 }
  0x12   : > { %382 = vmatpush3.bf16.msra.mxu0 %v419_v1  ;;  %v422_v4 = vld [vmem:[%s189_s16 + $0x18] sm:$0xff]   ;;  %v202_v5 = vld [vmem:[%s180_s23] sm:$0x1] }
  0x13   : > { %383 = vmatprep.subr.bf16.mxu0 %v447_v0 }
  0x16   : > { %384 = vmatpush3.bf16.msra.mxu0 %v420_v2 }
  0x17   : > { %385 = vmatprep.subr.bf16.mxu0 %v447_v0 }
  0x18   : > { %v201_v6 = vld [vmem:[%s194_s20] sm:$0x3] }
  0x1a   : > { %386 = vmatpush3.bf16.msra.mxu0 %v421_v3 }
  0x1b   : > { %387 = vmatprep.subr.bf16.mxu0 %v447_v0 }
  0x1e   : > { %388 = vmatpush3.bf16.msra.mxu0 %v422_v4 }
  0x21   : > { %390 = vmatmul.mubr.msk.bf16.vlgmr.msra.gmra.mrb[0].mxu0 %vm235_vm1, %v202_v5 }
  0xf4   : > { %v273_v7 = vpop.f32.mrb[0].mxu0 }
  0xf5   : > { %v279_v8 = vadd.f32 %v273_v7, %v201_v6  ;;  %v391_v9 = vpop.f32.mrb[1].mxu0 }
  0xf6   : > { %v276_v10 = vpop.f32.mrb[2].mxu0 }
  0xf7   : > { %280 = vst [vmem:[%s194_s20] sm:$0x3] %v279_v8  ;;  %v392_v11 = vpop.f32.mrb[3].mxu0 }
  0xf8 PF: > { %s12_s11 = sadd.s32 1, %s445_s11   ;;  %s503_s9 = smov %s441_s10 }
  0xf9   : > { %p9_p5 = scmp.ge.s32.totalorder %s12_s11, 4   ;;  %s504_s10 = smov %s506_s12 }
  0xfb   :  { %11 = sbr.rel (!%p9_p5) target bundleno = 2 (0x2), region = 65 }

// kernel: few_shot_seg_part_forward.5
= control target key start
LH: loop header
LB: loop body
LE: loop exit
PB: predicated region body
PF: predicated region fallthrough
CT: control target
= control target key end

     0   :  { %s978_s9 = smov 0   ;;  %s980_s10 = smov 0   ;;  %s1200_s0 = inlined_call_operand.vmem [shape: bf16[2,128,128], index: 0, kind: input, shape index: {}]   ;;  %s1201_s1 = inlined_call_operand.vmem [shape: bf16[2,128,8], index: 1, kind: input, shape index: {}]   ;;  %s1202_s2 = inlined_call_operand.vmem [shape: f32[2,128,2], index: 2, kind: output, shape index: {}]  }
   0x1   :  { %s982_s11 = smov 0  }
   0x2 LB: > { %s24_s12 = sadd.s32 1, %s957_s10  ;;  %p752_p0 = scmp.ge.s32.totalorder %s961_s11, 1  ;;  %s961_s11 = sphi %s982_s11, %s12_s11   ;;  %s957_s10 = sphi %s980_s10, %s1204_s10   ;;  %s953_s9 = sphi %s978_s9, %s1203_s9  }
   0x3   : > { %p26_p1 = scmp.ge.s32.totalorder %s24_s12, 2  ;;  %p143_p2 = scmp.lt.s32.totalorder %s961_s11, 3 }
   0x5   : > { %s1206_s12 = smov (%p26_p1, %s24_s12), 0  ;;  %p144_p3 = pnand %p752_p0, %p143_p2 }
   0x6   : > { %p179_p4 = scmp.lt.s32.totalorder (!%p144_p3), %s953_s9, 1  ;;  %vm501_vm0 = vcmask (!%p144_p3), 31744   ;;  %vm550_vm1 = vcmask (!%p144_p3), 64544   ;;  %vm599_vm2 = vcmask (!%p144_p3), 7168   ;;  %vm632_vm3 = vcmask (!%p144_p3), 15360  }
   0x7   : > { %147 = sbr.rel (%p144_p3) target bundleno = 611 (0x263), region = 28 }
   0xe   : > { %s1208_s9 = smov (!%p179_p4, %s953_s9), 1 }
   0xf   : > { %s769_s13 = sshll.u32 %s1208_s9, 6  ;;  %s771_s20 = sshll.u32 %s1208_s9, 7 }
  0x10   : > { %s1002_s16 = scalar_lea.vmem %s1200_s0, %s769_s13  ;;  %s1007_s19 = scalar_lea.vmem %s1201_s1, %s769_s13 }
  0x11   : > { %v807_v0 = vld [vmem:[%s1002_s16 + $0x20] sm:$0xff]   ;;  %v804_v6 = vld [vmem:[%s1002_s16 + $0x8] sm:$0xff]   ;;  %v805_v20 = vld [vmem:[%s1002_s16 + $0x10] sm:$0xff]   ;;  %s1141_s23 = scalar_lea.vmem %s1202_s2, %s771_s20 }
  0x12   : > { %v773_v1 = vld [vmem:[%s1002_s16] sm:$0xff]   ;;  %v1011_v2 = vunpack.c.l.bf16 %v807_v0  ;;  %v1015_v4 = vunpack.c.h.bf16 %v807_v0  ;;  %v808_v10 = vld [vmem:[%s1002_s16 + $0x28] sm:$0xff]   ;;  %v1031_v14 = vunpack.c.h.bf16 %v804_v6  ;;  %v1033_v15 = vunpack.c.l.bf16 %v804_v6  ;;  %v809_v25 = vld [vmem:[%s1002_s16 + $0x30] sm:$0xff]  }
  0x13   : > { %v1013_v3 = vunpack.c.l.bf16 %v773_v1  ;;  %v1017_v5 = vunpack.c.h.bf16 %v773_v1  ;;  %v899_v9 = vld [vmem:[%s1007_s19] sm:$0xff]   ;;  %v900_v11 = vld [vmem:[%s1007_s19 + $0x8] sm:$0xff]   ;;  %v1039_v18 = vunpack.c.h.bf16 %v808_v10  ;;  %v1041_v19 = vunpack.c.l.bf16 %v808_v10  ;;  %v806_v30 = vld [vmem:[%s1002_s16 + $0x18] sm:$0xff]  }
  0x14   : > { %v244_v7 = vmul.f32 %v1011_v2, %v1011_v2  ;;  %v245_v12 = vmul.f32 %v1015_v4, %v1015_v4  ;;  %827 = vmatprep.subr.bf16.mxu0 %v899_v9  ;;  %859 = vmatprep.subr.bf16.mxu1 %v899_v9  ;;  %v239_v16 = vmul.f32 %v1031_v14, %v1031_v14  ;;  %v1048_v23 = vunpack.c.h.bf16 %v805_v20  ;;  %v901_v31 = vld [vmem:[%s1007_s19 + $0x10] sm:$0xff]   ;;  %v810_v36 = vld [vmem:[%s1002_s16 + $0x38] sm:$0xff]   ;;  %v903_v42 = vld [vmem:[%s1007_s19 + $0x20] sm:$0xff]  }
  0x15   : > { %v236_v8 = vmul.f32 %v1013_v3, %v1013_v3  ;;  %v237_v13 = vmul.f32 %v1017_v5, %v1017_v5  ;;  %828 = vmatpush3.bf16.msra.mxu0 %v899_v9  ;;  %v238_v17 = vmul.f32 %v1033_v15, %v1033_v15  ;;  %867 = vmatpush3.bf16.msra.mxu1 %v899_v9  ;;  %v1050_v24 = vunpack.c.l.bf16 %v805_v20  ;;  %v902_v37 = vld [vmem:[%s1007_s19 + $0x18] sm:$0xff]   ;;  %v904_v45 = vld [vmem:[%s1007_s19 + $0x28] sm:$0xff]   ;;  %v905_v46 = vld [vmem:[%s1007_s19 + $0x30] sm:$0xff]  }
  0x16   : > { %268 = vadd.xlane.f32.xlu1 %v244_v7  ;;  %829 = vmatprep.subr.bf16.mxu0 %v900_v11  ;;  %v247_v21 = vmul.f32 %v1039_v18, %v1039_v18  ;;  %v246_v22 = vmul.f32 %v1041_v19, %v1041_v19  ;;  %v241_v26 = vmul.f32 %v1048_v23, %v1048_v23  ;;  %v1057_v28 = vunpack.c.h.bf16 %v809_v25  ;;  %v906_v47 = vld [vmem:[%s1007_s19 + $0x38] sm:$0xff]  }
  0x17   : > { %252 = vadd.xlane.f32.xlu0 %v236_v8  ;;  %860 = vmatprep.subr.bf16.mxu1 %v900_v11  ;;  %v240_v27 = vmul.f32 %v1050_v24, %v1050_v24  ;;  %v1059_v29 = vunpack.c.l.bf16 %v809_v25  ;;  %v1067_v34 = vunpack.c.h.bf16 %v806_v30  ;;  %v1069_v35 = vunpack.c.l.bf16 %v806_v30 }
  0x18   : > { %v249_v32 = vmul.f32 %v1057_v28, %v1057_v28  ;;  %v1077_v40 = vunpack.c.h.bf16 %v810_v36  ;;  %v1079_v41 = vunpack.c.l.bf16 %v810_v36 }
  0x19   : > { %830 = vmatpush3.bf16.msra.mxu0 %v900_v11  ;;  %868 = vmatpush3.bf16.msra.mxu1 %v900_v11  ;;  %v248_v33 = vmul.f32 %v1059_v29, %v1059_v29  ;;  %v243_v38 = vmul.f32 %v1067_v34, %v1067_v34  ;;  %v242_v39 = vmul.f32 %v1069_v35, %v1069_v35 }
  0x1a   : > { %270 = vadd.xlane.f32.xlu1 %v245_v12  ;;  %831 = vmatprep.subr.bf16.mxu0 %v901_v31  ;;  %v251_v43 = vmul.f32 %v1077_v40, %v1077_v40  ;;  %v250_v44 = vmul.f32 %v1079_v41, %v1079_v41 }
  0x1b   : > { %254 = vadd.xlane.f32.xlu0 %v237_v13  ;;  %861 = vmatprep.subr.bf16.mxu1 %v901_v31 }
  0x1d   : > { %832 = vmatpush3.bf16.msra.mxu0 %v901_v31  ;;  %869 = vmatpush3.bf16.msra.mxu1 %v901_v31 }
  0x1e   : > { %258 = vadd.xlane.f32.xlu1 %v239_v16  ;;  %833 = vmatprep.subr.bf16.mxu0 %v902_v37 }
  0x1f   : > { %256 = vadd.xlane.f32.xlu0 %v238_v17  ;;  %862 = vmatprep.subr.bf16.mxu1 %v902_v37 }
  0x21   : > { %834 = vmatpush3.bf16.msra.mxu0 %v902_v37  ;;  %870 = vmatpush3.bf16.msra.mxu1 %v902_v37 }
  0x22   : > { %274 = vadd.xlane.f32.xlu1 %v247_v21  ;;  %835 = vmatprep.subr.bf16.mxu0 %v903_v42 }
  0x23   : > { %272 = vadd.xlane.f32.xlu0 %v246_v22  ;;  %863 = vmatprep.subr.bf16.mxu1 %v903_v42 }
  0x25   : > { %836 = vmatpush3.bf16.msra.mxu0 %v903_v42  ;;  %871 = vmatpush3.bf16.msra.mxu1 %v903_v42 }
  0x26   : > { %262 = vadd.xlane.f32.xlu1 %v241_v26  ;;  %837 = vmatprep.subr.bf16.mxu0 %v904_v45 }
  0x27   : > { %260 = vadd.xlane.f32.xlu0 %v240_v27  ;;  %864 = vmatprep.subr.bf16.mxu1 %v904_v45 }
  0x29   : > { %838 = vmatpush3.bf16.msra.mxu0 %v904_v45  ;;  %872 = vmatpush3.bf16.msra.mxu1 %v904_v45 }
  0x2a   : > { %278 = vadd.xlane.f32.xlu1 %v249_v32  ;;  %839 = vmatprep.subr.bf16.mxu0 %v905_v46 }
  0x2b   : > { %276 = vadd.xlane.f32.xlu0 %v248_v33  ;;  %865 = vmatprep.subr.bf16.mxu1 %v905_v46 }
  0x2d   : > { %840 = vmatpush3.bf16.msra.mxu0 %v905_v46  ;;  %873 = vmatpush3.bf16.msra.mxu1 %v905_v46 }
  0x2e   : > { %266 = vadd.xlane.f32.xlu1 %v243_v38  ;;  %841 = vmatprep.subr.bf16.mxu0 %v906_v47 }
  0x2f   : > { %264 = vadd.xlane.f32.xlu0 %v242_v39  ;;  %866 = vmatprep.subr.bf16.mxu1 %v906_v47 }
  0x31   : > { %842 = vmatpush3.bf16.msra.mxu0 %v906_v47  ;;  %874 = vmatpush3.bf16.msra.mxu1 %v906_v47 }
  0x32   : > { %282 = vadd.xlane.f32.xlu1 %v251_v43 }
  0x33   : > { %280 = vadd.xlane.f32.xlu0 %v250_v44 }
  0xa3   : > { %v269_v48 = vpop.xlane.xlu1 %268 }
  0xa4   : > { %v253_v49 = vpop.xlane.xlu0 %252  ;;  %v292_v50 = vmax.f32 %v269_v48, 1e-16 }
  0xa5   : > { %v284_v51 = vmax.f32 %v253_v49, 1e-16 }
  0xa6   : > { %907 = vrsqrt.f32 %v292_v50 }
  0xa7   : > { %v271_v52 = vpop.xlane.xlu1 %270  ;;  %909 = vrsqrt.f32 %v284_v51 }
  0xa8   : > { %v255_v53 = vpop.xlane.xlu0 %254  ;;  %v293_v54 = vmax.f32 %v271_v52, 1e-16 }
  0xa9   : > { %v285_v55 = vmax.f32 %v255_v53, 1e-16 }
  0xaa   : > { %911 = vrsqrt.f32 %v293_v54 }
  0xab   : > { %913 = vrsqrt.f32 %v285_v55  ;;  %v259_v56 = vpop.xlane.xlu1 %258 }
  0xac   : > { %v257_v57 = vpop.xlane.xlu0 %256  ;;  %v287_v58 = vmax.f32 %v259_v56, 1e-16 }
  0xad   : > { %v286_v59 = vmax.f32 %v257_v57, 1e-16 }
  0xae   : > { %915 = vrsqrt.f32 %v287_v58 }
  0xaf   : > { %917 = vrsqrt.f32 %v286_v59  ;;  %v275_v60 = vpop.xlane.xlu1 %274 }
  0xb0   : > { %v273_v61 = vpop.xlane.xlu0 %272  ;;  %v295_v62 = vmax.f32 %v275_v60, 1e-16  ;;  %v908_v0 = vpop.eup %907 }
  0xb1   : > { %v294_v63 = vmax.f32 %v273_v61, 1e-16  ;;  %v910_v1 = vpop.eup %909  ;;  %v324_v12 = vmul.f32 %v908_v0, %v1011_v2 }
  0xb2   : > { %919 = vrsqrt.f32 %v295_v62  ;;  %v316_v16 = vmul.f32 %v910_v1, %v1013_v3 }
  0xb3   : > { %921 = vrsqrt.f32 %v294_v63  ;;  %v263_v6 = vpop.xlane.xlu1 %262 }
  0xb4   : > { %v261_v7 = vpop.xlane.xlu0 %260  ;;  %v912_v8 = vpop.eup %911  ;;  %v289_v9 = vmax.f32 %v263_v6, 1e-16 }
  0xb5   : > { %v288_v10 = vmax.f32 %v261_v7, 1e-16  ;;  %v914_v11 = vpop.eup %913  ;;  %v325_v13 = vmul.f32 %v912_v8, %v1015_v4 }
  0xb6   : > { %v317_v17 = vmul.f32 %v914_v11, %v1017_v5  ;;  %923 = vrsqrt.f32 %v289_v9 }
  0xb7   : > { %v336_v20 = vpack.c.bf16 %v325_v13, %v324_v12  ;;  %925 = vrsqrt.f32 %v288_v10  ;;  %v279_v21 = vpop.xlane.xlu1 %278 }
  0xb8   : > { %v277_v22 = vpop.xlane.xlu0 %276  ;;  %v916_v25 = vpop.eup %915  ;;  %v332_v26 = vpack.c.bf16 %v317_v17, %v316_v16  ;;  %v297_v27 = vmax.f32 %v279_v21, 1e-16 }
  0xb9   : > { %v296_v30 = vmax.f32 %v277_v22, 1e-16  ;;  %v918_v31 = vpop.eup %917  ;;  %851 = vmatprep.mubr.bf16.mxu1 %v336_v20  ;;  %v319_v32 = vmul.f32 %v916_v25, %v1031_v14 }
  0xba   : > { %843 = vmatprep.mubr.bf16.mxu0 %v332_v26  ;;  %v318_v2 = vmul.f32 %v918_v31, %v1033_v15  ;;  %927 = vrsqrt.f32 %v297_v27 }
  0xbb   : > { %929 = vrsqrt.f32 %v296_v30  ;;  %v267_v3 = vpop.xlane.xlu1 %266 }
  0xbc   : > { %v265_v4 = vpop.xlane.xlu0 %264  ;;  %v920_v5 = vpop.eup %919  ;;  %v333_v33 = vpack.c.bf16 %v319_v32, %v318_v2  ;;  %v291_v36 = vmax.f32 %v267_v3, 1e-16 }
  0xbd   : > { %v290_v37 = vmax.f32 %v265_v4, 1e-16  ;;  %v922_v38 = vpop.eup %921  ;;  %v327_v39 = vmul.f32 %v920_v5, %v1039_v18 }
  0xbe   : > { %844 = vmatmul.mubr.bf16.vlgmr.msra.gmra.mrb[0].mxu0 %v333_v33  ;;  %v326_v42 = vmul.f32 %v922_v38, %v1041_v19  ;;  %931 = vrsqrt.f32 %v291_v36 }
  0xbf   : > { %933 = vrsqrt.f32 %v290_v37  ;;  %v283_v14 = vpop.xlane.xlu1 %282 }
  0xc0   : > { %v281_v43 = vpop.xlane.xlu0 %280  ;;  %v924_v44 = vpop.eup %923  ;;  %v337_v15 = vpack.c.bf16 %v327_v39, %v326_v42  ;;  %v299_v45 = vmax.f32 %v283_v14, 1e-16 }
  0xc1   : > { %v298_v46 = vmax.f32 %v281_v43, 1e-16  ;;  %v926_v47 = vpop.eup %925  ;;  %v321_v48 = vmul.f32 %v924_v44, %v1048_v23 }
  0xc2   : > { %852 = vmatmul.mubr.bf16.vlgmr.msra.gmra.mrb[0].mxu1 %v337_v15  ;;  %935 = vrsqrt.f32 %v299_v45  ;;  %v320_v49 = vmul.f32 %v926_v47, %v1050_v24 }
  0xc3   : > { %937 = vrsqrt.f32 %v298_v46 }
  0xc4   : > { %v928_v18 = vpop.eup %927  ;;  %v334_v50 = vpack.c.bf16 %v321_v48, %v320_v49 }
  0xc5   : > { %v930_v51 = vpop.eup %929  ;;  %v329_v19 = vmul.f32 %v928_v18, %v1057_v28 }
  0xc6   : > { %847 = vmatprep.mubr.bf16.mxu0 %v334_v50  ;;  %v328_v52 = vmul.f32 %v930_v51, %v1059_v29 }
  0xc8   : > { %v932_v53 = vpop.eup %931  ;;  %v338_v54 = vpack.c.bf16 %v329_v19, %v328_v52 }
  0xc9   : > { %v934_v55 = vpop.eup %933  ;;  %v323_v56 = vmul.f32 %v932_v53, %v1067_v34 }
  0xca   : > { %855 = vmatprep.mubr.bf16.mxu1 %v338_v54  ;;  %v322_v23 = vmul.f32 %v934_v55, %v1069_v35 }
  0xcc   : > { %v936_v57 = vpop.eup %935  ;;  %v335_v58 = vpack.c.bf16 %v323_v56, %v322_v23 }
  0xcd   : > { %v938_v24 = vpop.eup %937  ;;  %v331_v59 = vmul.f32 %v936_v57, %v1077_v40 }
  0xce   : > { %848 = vmatmul.mubr.bf16.gmra.mrb[4].mxu0 %v335_v58  ;;  %v330_v60 = vmul.f32 %v938_v24, %v1079_v41 }
  0xd0   : > { %v339_v28 = vpack.c.bf16 %v331_v59, %v330_v60 }
  0xd2   : > { %856 = vmatmul.mubr.bf16.gmra.mrb[4].mxu1 %v339_v28 }
 0x191   : > { %v845_v29 = vpop.f32.mrb[0].mxu0 }
 0x192   : > { %v438_v61 = vpop.f32.mrb[1].mxu0  ;;  %v508_v62 = vsel %vm501_vm0, %v845_v29, -inf  ;;  %v557_v8 = vsel %vm550_vm1, %v845_v29, -inf }
 0x193   : > { %509 = vmax.xlane.f32.xlu0 %v508_v62  ;;  %v846_v34 = vpop.f32.mrb[2].mxu0  ;;  %v502_v13 = vsel %vm501_vm0, %v438_v61, -inf  ;;  %v551_v32 = vsel %vm550_vm1, %v438_v61, -inf }
 0x194   : > { %v441_v63 = vpop.f32.mrb[3].mxu0  ;;  %v511_v35 = vsel %vm501_vm0, %v846_v34, -inf  ;;  %v560_v9 = vsel %vm550_vm1, %v846_v34, -inf }
 0x195   : > { %512 = vmax.xlane.f32.xlu1 %v511_v35  ;;  %v853_v0 = vpop.f32.mrb[0].mxu1  ;;  %v505_v20 = vsel %vm501_vm0, %v441_v63, -inf  ;;  %v554_v2 = vsel %vm550_vm1, %v441_v63, -inf }
 0x196   : > { %v470_v1 = vpop.f32.mrb[1].mxu1  ;;  %v532_v40 = vsel %vm501_vm0, %v853_v0, -inf  ;;  %v581_v10 = vsel %vm550_vm1, %v853_v0, -inf }
 0x197   : > { %533 = vmax.xlane.f32.xlu0 %v532_v40  ;;  %v854_v6 = vpop.f32.mrb[2].mxu1  ;;  %v526_v25 = vsel %vm501_vm0, %v470_v1, -inf  ;;  %v575_v3 = vsel %vm550_vm1, %v470_v1, -inf }
 0x198   : > { %v473_v41 = vpop.f32.mrb[3].mxu1  ;;  %v535_v7 = vsel %vm501_vm0, %v854_v6, -inf  ;;  %v584_v11 = vsel %vm550_vm1, %v854_v6, -inf }
 0x199   : > { %536 = vmax.xlane.f32.xlu1 %v535_v7  ;;  %v529_v30 = vsel %vm501_vm0, %v473_v41, -inf  ;;  %v578_v4 = vsel %vm550_vm1, %v473_v41, -inf }
 0x19b   : > { %558 = vmax.xlane.f32.xlu0 %v557_v8 }
 0x19d   : > { %561 = vmax.xlane.f32.xlu1 %v560_v9 }
 0x19f   : > { %582 = vmax.xlane.f32.xlu0 %v581_v10 }
 0x1a1   : > { %585 = vmax.xlane.f32.xlu1 %v584_v11  ;;  %v849_v12 = vpop.f32.mrb[4].mxu0 }
 0x1a2   : > { %v454_v16 = vpop.f32.mrb[5].mxu0  ;;  %v520_v5 = vsel %vm501_vm0, %v849_v12, -inf  ;;  %v569_v38 = vsel %vm550_vm1, %v849_v12, -inf }
 0x1a3   : > { %503 = vmax.xlane.f32.xlu0 %v502_v13  ;;  %v850_v17 = vpop.f32.mrb[6].mxu0  ;;  %v514_v42 = vsel %vm501_vm0, %v454_v16, -inf  ;;  %v563_v15 = vsel %vm550_vm1, %v454_v16, -inf }
 0x1a4   : > { %v457_v21 = vpop.f32.mrb[7].mxu0  ;;  %v523_v33 = vsel %vm501_vm0, %v850_v17, -inf  ;;  %v572_v39 = vsel %vm550_vm1, %v850_v17, -inf }
 0x1a5   : > { %506 = vmax.xlane.f32.xlu1 %v505_v20  ;;  %v857_v22 = vpop.f32.mrb[4].mxu1  ;;  %v517_v14 = vsel %vm501_vm0, %v457_v21, -inf  ;;  %v566_v45 = vsel %vm550_vm1, %v457_v21, -inf }
 0x1a6   : > { %v486_v26 = vpop.f32.mrb[5].mxu1  ;;  %v544_v36 = vsel %vm501_vm0, %v857_v22, -inf  ;;  %v593_v48 = vsel %vm550_vm1, %v857_v22, -inf }
 0x1a7   : > { %527 = vmax.xlane.f32.xlu0 %v526_v25  ;;  %v858_v27 = vpop.f32.mrb[6].mxu1  ;;  %v538_v43 = vsel %vm501_vm0, %v486_v26, -inf  ;;  %v587_v46 = vsel %vm550_vm1, %v486_v26, -inf }
 0x1a8   : > { %v489_v31 = vpop.f32.mrb[7].mxu1  ;;  %v547_v37 = vsel %vm501_vm0, %v858_v27, -inf  ;;  %v596_v49 = vsel %vm550_vm1, %v858_v27, -inf }
 0x1a9   : > { %530 = vmax.xlane.f32.xlu1 %v529_v30  ;;  %v541_v44 = vsel %vm501_vm0, %v489_v31, -inf  ;;  %v590_v47 = vsel %vm550_vm1, %v489_v31, -inf }
 0x1ab   : > { %552 = vmax.xlane.f32.xlu0 %v551_v32 }
 0x1ad   : > { %555 = vmax.xlane.f32.xlu1 %v554_v2 }
 0x1af   : > { %576 = vmax.xlane.f32.xlu0 %v575_v3 }
 0x1b1   : > { %579 = vmax.xlane.f32.xlu1 %v578_v4 }
 0x1b3   : > { %521 = vmax.xlane.f32.xlu0 %v520_v5 }
 0x1b5   : > { %524 = vmax.xlane.f32.xlu1 %v523_v33 }
 0x1b7   : > { %545 = vmax.xlane.f32.xlu0 %v544_v36 }
 0x1b9   : > { %548 = vmax.xlane.f32.xlu1 %v547_v37 }
 0x1bb   : > { %570 = vmax.xlane.f32.xlu0 %v569_v38 }
 0x1bd   : > { %573 = vmax.xlane.f32.xlu1 %v572_v39 }
 0x1bf   : > { %515 = vmax.xlane.f32.xlu0 %v514_v42 }
 0x1c1   : > { %518 = vmax.xlane.f32.xlu1 %v517_v14 }
 0x1c3   : > { %539 = vmax.xlane.f32.xlu0 %v538_v43 }
 0x1c5   : > { %542 = vmax.xlane.f32.xlu1 %v541_v44 }
 0x1c7   : > { %564 = vmax.xlane.f32.xlu0 %v563_v15 }
 0x1c9   : > { %567 = vmax.xlane.f32.xlu1 %v566_v45 }
 0x1cb   : > { %588 = vmax.xlane.f32.xlu0 %v587_v46 }
 0x1cd   : > { %591 = vmax.xlane.f32.xlu1 %v590_v47 }
 0x1cf   : > { %594 = vmax.xlane.f32.xlu0 %v593_v48 }
 0x1d1   : > { %597 = vmax.xlane.f32.xlu1 %v596_v49 }
 0x220   : > { %v510_v18 = vpop.xlane.xlu0 %509 }
 0x222   : > { %v513_v50 = vpop.xlane.xlu1 %512 }
 0x224   : > { %v534_v51 = vpop.xlane.xlu0 %533 }
 0x226   : > { %v537_v19 = vpop.xlane.xlu1 %536 }
 0x228   : > { %v559_v52 = vpop.xlane.xlu0 %558 }
 0x229   : > { %v602_v53 = vsel %vm599_vm2, %v510_v18, %v559_v52 }
 0x22a   : > { %v618_v54 = vmul.f32 20.0, %v602_v53  ;;  %v562_v55 = vpop.xlane.xlu1 %561 }
 0x22b   : > { %v603_v56 = vsel %vm599_vm2, %v513_v50, %v562_v55 }
 0x22c   : > { %635 = vst.msk [vmem:[%s1141_s23 + $0x10] sm:$0xff] %vm632_vm3, %v618_v54  ;;  %v619_v23 = vmul.f32 20.0, %v603_v56  ;;  %v583_v57 = vpop.xlane.xlu0 %582 }
 0x22d   : > { %v610_v58 = vsel %vm599_vm2, %v534_v51, %v583_v57 }
 0x22e   : > { %636 = vst.msk [vmem:[%s1141_s23 + $0x18] sm:$0xff] %vm632_vm3, %v619_v23  ;;  %v626_v24 = vmul.f32 20.0, %v610_v58  ;;  %v586_v59 = vpop.xlane.xlu1 %585 }
 0x22f   : > { %v611_v60 = vsel %vm599_vm2, %v537_v19, %v586_v59 }
 0x230   : > { %643 = vst.msk [vmem:[%s1141_s23 + $0x50] sm:$0xff] %vm632_vm3, %v626_v24  ;;  %v627_v28 = vmul.f32 20.0, %v611_v60  ;;  %v504_v29 = vpop.xlane.xlu0 %503 }
 0x232   : > { %644 = vst.msk [vmem:[%s1141_s23 + $0x58] sm:$0xff] %vm632_vm3, %v627_v28  ;;  %v507_v61 = vpop.xlane.xlu1 %506 }
 0x234   : > { %v528_v62 = vpop.xlane.xlu0 %527 }
 0x236   : > { %v531_v34 = vpop.xlane.xlu1 %530 }
 0x238   : > { %v553_v63 = vpop.xlane.xlu0 %552 }
 0x239   : > { %v600_v35 = vsel %vm599_vm2, %v504_v29, %v553_v63 }
 0x23a   : > { %v616_v0 = vmul.f32 20.0, %v600_v35  ;;  %v556_v1 = vpop.xlane.xlu1 %555 }
 0x23b   : > { %v601_v40 = vsel %vm599_vm2, %v507_v61, %v556_v1 }
 0x23c   : > { %633 = vst.msk [vmem:[%s1141_s23] sm:$0xff] %vm632_vm3, %v616_v0  ;;  %v617_v6 = vmul.f32 20.0, %v601_v40  ;;  %v577_v41 = vpop.xlane.xlu0 %576 }
 0x23d   : > { %v608_v7 = vsel %vm599_vm2, %v528_v62, %v577_v41 }
 0x23e   : > { %634 = vst.msk [vmem:[%s1141_s23 + $0x8] sm:$0xff] %vm632_vm3, %v617_v6  ;;  %v624_v8 = vmul.f32 20.0, %v608_v7  ;;  %v580_v9 = vpop.xlane.xlu1 %579 }
 0x23f   : > { %v609_v10 = vsel %vm599_vm2, %v531_v34, %v580_v9 }
 0x240   : > { %641 = vst.msk [vmem:[%s1141_s23 + $0x40] sm:$0xff] %vm632_vm3, %v624_v8  ;;  %v625_v11 = vmul.f32 20.0, %v609_v10  ;;  %v522_v12 = vpop.xlane.xlu0 %521 }
 0x242   : > { %642 = vst.msk [vmem:[%s1141_s23 + $0x48] sm:$0xff] %vm632_vm3, %v625_v11  ;;  %v525_v13 = vpop.xlane.xlu1 %524 }
 0x244   : > { %v546_v16 = vpop.xlane.xlu0 %545 }
 0x246   : > { %v549_v17 = vpop.xlane.xlu1 %548 }
 0x248   : > { %v571_v20 = vpop.xlane.xlu0 %570 }
 0x249   : > { %v606_v21 = vsel %vm599_vm2, %v522_v12, %v571_v20 }
 0x24a   : > { %v622_v22 = vmul.f32 20.0, %v606_v21  ;;  %v574_v25 = vpop.xlane.xlu1 %573 }
 0x24b   : > { %v607_v26 = vsel %vm599_vm2, %v525_v13, %v574_v25 }
 0x24c   : > { %639 = vst.msk [vmem:[%s1141_s23 + $0x30] sm:$0xff] %vm632_vm3, %v622_v22  ;;  %v623_v27 = vmul.f32 20.0, %v607_v26  ;;  %v516_v30 = vpop.xlane.xlu0 %515 }
 0x24e   : > { %640 = vst.msk [vmem:[%s1141_s23 + $0x38] sm:$0xff] %vm632_vm3, %v623_v27  ;;  %v519_v31 = vpop.xlane.xlu1 %518 }
 0x250   : > { %v540_v32 = vpop.xlane.xlu0 %539 }
 0x252   : > { %v543_v2 = vpop.xlane.xlu1 %542 }
 0x254   : > { %v565_v3 = vpop.xlane.xlu0 %564 }
 0x255   : > { %v604_v4 = vsel %vm599_vm2, %v516_v30, %v565_v3 }
 0x256   : > { %v620_v5 = vmul.f32 20.0, %v604_v4  ;;  %v568_v33 = vpop.xlane.xlu1 %567 }
 0x257   : > { %v605_v36 = vsel %vm599_vm2, %v519_v31, %v568_v33 }
 0x258   : > { %637 = vst.msk [vmem:[%s1141_s23 + $0x20] sm:$0xff] %vm632_vm3, %v620_v5  ;;  %v621_v37 = vmul.f32 20.0, %v605_v36  ;;  %v589_v38 = vpop.xlane.xlu0 %588 }
 0x259   : > { %v612_v39 = vsel %vm599_vm2, %v540_v32, %v589_v38 }
 0x25a   : > { %638 = vst.msk [vmem:[%s1141_s23 + $0x28] sm:$0xff] %vm632_vm3, %v621_v37  ;;  %v628_v42 = vmul.f32 20.0, %v612_v39  ;;  %v592_v14 = vpop.xlane.xlu1 %591 }
 0x25b   : > { %v613_v43 = vsel %vm599_vm2, %v543_v2, %v592_v14 }
 0x25c   : > { %645 = vst.msk [vmem:[%s1141_s23 + $0x60] sm:$0xff] %vm632_vm3, %v628_v42  ;;  %v629_v44 = vmul.f32 20.0, %v613_v43  ;;  %v595_v15 = vpop.xlane.xlu0 %594 }
 0x25d   : > { %v614_v45 = vsel %vm599_vm2, %v546_v16, %v595_v15 }
 0x25e   : > { %646 = vst.msk [vmem:[%s1141_s23 + $0x68] sm:$0xff] %vm632_vm3, %v629_v44  ;;  %v630_v46 = vmul.f32 20.0, %v614_v45  ;;  %v598_v47 = vpop.xlane.xlu1 %597 }
 0x25f   : > { %v615_v48 = vsel %vm599_vm2, %v549_v17, %v598_v47 }
 0x260   : > { %647 = vst.msk [vmem:[%s1141_s23 + $0x70] sm:$0xff] %vm632_vm3, %v630_v46  ;;  %v631_v49 = vmul.f32 20.0, %v615_v48 }
 0x262   : > { %648 = vst.msk [vmem:[%s1141_s23 + $0x78] sm:$0xff] %vm632_vm3, %v631_v49 }
 0x263 PF: > { %s12_s11 = sadd.s32 1, %s961_s11   ;;  %s1203_s9 = smov %s957_s10 }
 0x264   : > { %p9_p5 = scmp.ge.s32.totalorder %s12_s11, 4   ;;  %s1204_s10 = smov %s1206_s12 }
 0x266   :  { %11 = sbr.rel (!%p9_p5) target bundleno = 2 (0x2), region = 61 }

</bundles_post_ra>
